<compile_context>
chip_gen: v7x
topology: tpu7x:2x2x1
jax: 0.10.0
libtpu: 0.0.40
codegen_flags: <defaults>
</compile_context>

<pallas_src>
import math

import jax
import jax.numpy as jnp
from jax.experimental import pallas as pl
from jax.experimental.pallas import tpu as pltpu


_TWO_PI = 6.283185307179586

# Taylor coefficients for sin/cos on the reduced argument y in [-pi/4, pi/4]
# (truncation error < ~4e-7, well inside f32).
_S1, _S2, _S3 = -1.0 / 6.0, 1.0 / 120.0, -1.0 / 5040.0
_C1, _C2, _C3, _C4 = -0.5, 1.0 / 24.0, -1.0 / 720.0, 1.0 / 40320.0


def _gfp_kernel(x_ref, w_ref, o_ref):
    # x_ref: (TB, 1) f32, w_ref: (1, half) f32 (raw W, no 2*pi folded),
    # o_ref: (TB, 2*half) out_dtype
    half = w_ref.shape[1]

    # Outer product in "turns": angle = 2*pi * t,  t = x * W.     (VPU)
    t = x_ref[...] * w_ref[...]                        # (TB, half) f32

    # ---- shared range reduction (done ONCE for both sin and cos) ----
    # angle = k*(pi/2) + y,  k = round(4t),  y = 2*pi*(t - k/4) in [-pi/4, pi/4]
    kf = jnp.round(t * 4.0)
    k = kf.astype(jnp.int32)
    f = t - kf * 0.25                                  # exact (Sterbenz)
    y = f * _TWO_PI
    z = y * y

    # ---- polynomials on the reduced argument ----
    s = y * (1.0 + z * (_S1 + z * (_S2 + z * _S3)))           # sin(y)
    c = 1.0 + z * (_C1 + z * (_C2 + z * (_C3 + z * _C4)))     # cos(y)

    # ---- quadrant fix-up: sin/cos(k*pi/2 + y) ----
    m = jnp.bitwise_and(k, 3)                          # k mod 4 in {0,1,2,3}
    swap = jnp.bitwise_and(m, 1) == 1                  # quadrants 1,3: swap
    sin_v = jnp.where(swap, c, s)
    cos_v = jnp.where(swap, s, c)
    sin_v = jnp.where(m >= 2, -sin_v, sin_v)                   # quadrants 2,3
    cos_v = jnp.where((m == 1) | (m == 2), -cos_v, cos_v)      # quadrants 1,2

    sin_v = sin_v.astype(o_ref.dtype)
    cos_v = cos_v.astype(o_ref.dtype)

    if half % 128 == 0:
        # Both slabs start on a lane boundary: two direct, unmasked stores.
        o_ref[:, :half] = sin_v
        o_ref[:, half:] = cos_v
    else:
        # half not lane-aligned: build the full row in registers (XLU shuffle,
        # otherwise-idle slot) and issue a single dense store of the tile.
        o_ref[...] = jnp.concatenate([sin_v, cos_v], axis=-1)


def gaussian_fourier_projection(x, W, *, out_dtype=jnp.float32):
    """x: (B,) float, W: (embed_dim//2,) float -> (B, embed_dim) out_dtype."""
    B = x.shape[0]
    half = W.shape[0]
    embed_dim = 2 * half

    w2 = W.astype(jnp.float32).reshape(1, half)

    # --- batch tile sizing ---------------------------------------------------
    # Per-row VMEM bytes: double-buffered output row (2 * embed_dim * 4),
    # double-buffered lane-padded (TB, 1) x row (2 * 128 * 4 = 1024 B), plus
    # ~4 live (TB, half) f32 elementwise temporaries (4 * half * 4).
    per_row = 16 * embed_dim + 1024
    vmem_budget = 20 * 1024 * 1024        # fits every TPU generation w/ headroom
    tb = vmem_budget // per_row
    tb = max(8, min(8192, (tb // 8) * 8))  # sublane multiple, sane cap

    b_pad8 = ((B + 7) // 8) * 8
    tb = min(tb, b_pad8)
    # Never collapse to a single grid step when there is enough work: keeps the
    # batch axis splittable across the two TensorCores on v7x.
    if b_pad8 >= 16 and tb >= b_pad8:
        tb = (((b_pad8 + 1) // 2 + 7) // 8) * 8

    n_tiles = pl.cdiv(B, tb)
    b_in = n_tiles * tb

    # Pad only the tiny (B, 1) input; the output is written at exact size
    # (Pallas clips the ragged final output block), so no out[:B] copy.
    x2 = x.astype(jnp.float32).reshape(B, 1)
    if b_in != B:
        x2 = jnp.pad(x2, ((0, b_in - B), (0, 0)))

    return pl.pallas_call(
        _gfp_kernel,
        out_shape=jax.ShapeDtypeStruct((B, embed_dim), out_dtype),
        grid=(n_tiles,),
        in_specs=[
            pl.BlockSpec((tb, 1), lambda i: (i, 0)),       # x tile, streamed
            pl.BlockSpec((1, half), lambda i: (0, 0)),     # W, VMEM-resident
        ],
        out_specs=pl.BlockSpec((tb, embed_dim), lambda i: (i, 0)),
        compiler_params=pltpu.CompilerParams(
            dimension_semantics=("parallel",),
            vmem_limit_bytes=32 * 1024 * 1024,
        ),
    )(x2, w2)


if __name__ == "__main__":
    key = jax.random.PRNGKey(0)
    kx, kw = jax.random.split(key)

    embed_dim = 32
    scale = 30.0
    batch = 16

    # Frozen parameter: randn(embed_dim // 2) * scale (deterministic here).
    W = jax.random.normal(kw, (embed_dim // 2,), dtype=jnp.float32) * scale
    x = jax.random.normal(kx, (batch,), dtype=jnp.float32)

    out = gaussian_fourier_projection(x, W)
    out = jax.block_until_ready(out)

    # Reference (PyTorch-equivalent) in plain JAX.
    x_proj = x[:, None] * W[None, :] * 2.0 * math.pi
    ref = jnp.concatenate([jnp.sin(x_proj), jnp.cos(x_proj)], axis=-1)

    assert out.shape == (batch, embed_dim)
    # With scale=30 the arguments reach O(1e3) radians, so a 1-ulp difference
    # in the f32 argument (reference computes fl(x*W*2*pi), kernel reduces in
    # turns) is ~1e-4 after sin/cos; 2e-3 absolute tolerance covers that while
    # the kernel's own polynomial error is ~1e-6.
    err = float(jnp.max(jnp.abs(out - ref)))
    assert err < 2e-3, f"max abs err {err}"

    print("KERNEL_OK")
</pallas_src>

<mosaic_0001>
module attributes {stable_mosaic.version = 11 : i64} {
  func.func @_gfp_kernel(%arg0: i32, %arg1: memref<8x1xf32, #tpu.memory_space<vmem>>, %arg2: memref<1x16xf32, #tpu.memory_space<vmem>>, %arg3: memref<8x32xf32, #tpu.memory_space<vmem>>) attributes {dimension_semantics = [#tpu.dimension_semantics<parallel>], iteration_bounds = array<i64: 2>, scalar_prefetch = 0 : i64, scratch_operands = 0 : i64, tpu.core_type = #tpu.core_type<tc>, window_params = [{transform_indices = @transform_0, window_bounds = array<i64: 8, 1>}, {pipeline_mode = #tpu.pipeline_mode<synchronous>, transform_indices = @transform_1, window_bounds = array<i64: 1, 16>}, {transform_indices = @transform_2, window_bounds = array<i64: 8, 32>}]} {
    %c0 = arith.constant 0 : index
    %c0_0 = arith.constant 0 : index
    %0 = vector.load %arg1[%c0, %c0_0] : memref<8x1xf32, #tpu.memory_space<vmem>>, vector<8x1xf32>
    %c0_1 = arith.constant 0 : index
    %c0_2 = arith.constant 0 : index
    %1 = vector.load %arg2[%c0_1, %c0_2] : memref<1x16xf32, #tpu.memory_space<vmem>>, vector<1x16xf32>
    %2 = vector.broadcast %0 : vector<8x1xf32> to vector<8x16xf32>
    %3 = vector.broadcast %1 : vector<1x16xf32> to vector<8x16xf32>
    %4 = arith.mulf %2, %3 : vector<8x16xf32>
    %cst = arith.constant 4.000000e+00 : f32
    %5 = vector.broadcast %cst : f32 to vector<8x16xf32>
    %6 = arith.mulf %4, %5 : vector<8x16xf32>
    %7 = math.roundeven %6 : vector<8x16xf32>
    %8 = arith.fptosi %7 : vector<8x16xf32> to vector<8x16xi32>
    %cst_3 = arith.constant 2.500000e-01 : f32
    %9 = vector.broadcast %cst_3 : f32 to vector<8x16xf32>
    %10 = arith.mulf %7, %9 : vector<8x16xf32>
    %11 = arith.subf %4, %10 : vector<8x16xf32>
    %cst_4 = arith.constant 6.28318548 : f32
    %12 = vector.broadcast %cst_4 : f32 to vector<8x16xf32>
    %13 = arith.mulf %11, %12 : vector<8x16xf32>
    %14 = arith.mulf %13, %13 : vector<8x16xf32>
    %cst_5 = arith.constant -1.98412701E-4 : f32
    %15 = vector.broadcast %cst_5 : f32 to vector<8x16xf32>
    %16 = arith.mulf %14, %15 : vector<8x16xf32>
    %cst_6 = arith.constant 0.00833333377 : f32
    %17 = vector.broadcast %cst_6 : f32 to vector<8x16xf32>
    %18 = arith.addf %17, %16 : vector<8x16xf32>
    %19 = arith.mulf %14, %18 : vector<8x16xf32>
    %cst_7 = arith.constant -0.166666672 : f32
    %20 = vector.broadcast %cst_7 : f32 to vector<8x16xf32>
    %21 = arith.addf %20, %19 : vector<8x16xf32>
    %22 = arith.mulf %14, %21 : vector<8x16xf32>
    %cst_8 = arith.constant 1.000000e+00 : f32
    %23 = vector.broadcast %cst_8 : f32 to vector<8x16xf32>
    %24 = arith.addf %23, %22 : vector<8x16xf32>
    %25 = arith.mulf %13, %24 : vector<8x16xf32>
    %cst_9 = arith.constant 2.48015876E-5 : f32
    %26 = vector.broadcast %cst_9 : f32 to vector<8x16xf32>
    %27 = arith.mulf %14, %26 : vector<8x16xf32>
    %cst_10 = arith.constant -0.00138888892 : f32
    %28 = vector.broadcast %cst_10 : f32 to vector<8x16xf32>
    %29 = arith.addf %28, %27 : vector<8x16xf32>
    %30 = arith.mulf %14, %29 : vector<8x16xf32>
    %cst_11 = arith.constant 0.0416666679 : f32
    %31 = vector.broadcast %cst_11 : f32 to vector<8x16xf32>
    %32 = arith.addf %31, %30 : vector<8x16xf32>
    %33 = arith.mulf %14, %32 : vector<8x16xf32>
    %cst_12 = arith.constant -5.000000e-01 : f32
    %34 = vector.broadcast %cst_12 : f32 to vector<8x16xf32>
    %35 = arith.addf %34, %33 : vector<8x16xf32>
    %36 = arith.mulf %14, %35 : vector<8x16xf32>
    %cst_13 = arith.constant 1.000000e+00 : f32
    %37 = vector.broadcast %cst_13 : f32 to vector<8x16xf32>
    %38 = arith.addf %37, %36 : vector<8x16xf32>
    %c3_i32 = arith.constant 3 : i32
    %39 = vector.broadcast %c3_i32 : i32 to vector<8x16xi32>
    %40 = arith.andi %8, %39 : vector<8x16xi32>
    %c1_i32 = arith.constant 1 : i32
    %41 = vector.broadcast %c1_i32 : i32 to vector<8x16xi32>
    %42 = arith.andi %40, %41 : vector<8x16xi32>
    %c1_i32_14 = arith.constant 1 : i32
    %43 = vector.broadcast %c1_i32_14 : i32 to vector<8x16xi32>
    %44 = arith.cmpi eq, %42, %43 : vector<8x16xi32>
    %45 = arith.select %44, %38, %25 : vector<8x16xi1>, vector<8x16xf32>
    %46 = arith.select %44, %25, %38 : vector<8x16xi1>, vector<8x16xf32>
    %c2_i32 = arith.constant 2 : i32
    %47 = vector.broadcast %c2_i32 : i32 to vector<8x16xi32>
    %48 = arith.cmpi sge, %40, %47 : vector<8x16xi32>
    %cst_15 = arith.constant 0.000000e+00 : f32
    %49 = vector.broadcast %cst_15 : f32 to vector<8x16xf32>
    %50 = arith.subf %49, %45 : vector<8x16xf32>
    %51 = arith.select %48, %50, %45 : vector<8x16xi1>, vector<8x16xf32>
    %c1_i32_16 = arith.constant 1 : i32
    %52 = vector.broadcast %c1_i32_16 : i32 to vector<8x16xi32>
    %53 = arith.cmpi eq, %40, %52 : vector<8x16xi32>
    %c2_i32_17 = arith.constant 2 : i32
    %54 = vector.broadcast %c2_i32_17 : i32 to vector<8x16xi32>
    %55 = arith.cmpi eq, %40, %54 : vector<8x16xi32>
    %56 = arith.ori %53, %55 : vector<8x16xi1>
    %cst_18 = arith.constant 0.000000e+00 : f32
    %57 = vector.broadcast %cst_18 : f32 to vector<8x16xf32>
    %58 = arith.subf %57, %46 : vector<8x16xf32>
    %59 = arith.select %56, %58, %46 : vector<8x16xi1>, vector<8x16xf32>
    %60 = tpu.concatenate %51, %59 in 1 : vector<8x16xf32>, vector<8x16xf32> -> vector<8x32xf32>
    %c0_19 = arith.constant 0 : index
    %c0_20 = arith.constant 0 : index
    %61 = vector.load %arg3[%c0_19, %c0_20] : memref<8x32xf32, #tpu.memory_space<vmem>>, vector<8x32xf32>
    tpu.vector_store %arg3[%c0_19, %c0_20], %60 {strides = array<i32>} : memref<8x32xf32, #tpu.memory_space<vmem>>, vector<8x32xf32>,
    return
  }
  func.func @transform_0(%arg0: i32) -> (i32, i32) {
    %c0_i32 = arith.constant 0 : i32
    %c0_i32_0 = arith.constant 0 : i32
    return %arg0, %c0_i32 : i32, i32
  }
  func.func @transform_1(%arg0: i32) -> (i32, i32) {
    %c0_i32 = arith.constant 0 : i32
    %c0_i32_0 = arith.constant 0 : i32
    %c0_i32_1 = arith.constant 0 : i32
    return %c0_i32, %c0_i32_0 : i32, i32
  }
  func.func @transform_2(%arg0: i32) -> (i32, i32) {
    %c0_i32 = arith.constant 0 : i32
    %c0_i32_0 = arith.constant 0 : i32
    return %arg0, %c0_i32 : i32, i32
  }
}

</mosaic_0001>

<bundles_post_ra>
// kernel: tpu_custom_call.1
= control target key start
LH: loop header
LB: loop body
LE: loop exit
PB: predicated region body
PF: predicated region fallthrough
CT: control target
= control target key end

     0   :  { %7 = vsyncpa [#allocation3], 0  ;;  %s511_s0 = inlined_call_operand.vmem [shape: f32[16,1], index: 0, kind: input, shape index: {}]   ;;  %s512_s1 = inlined_call_operand.vmem [shape: f32[1,16], index: 1, kind: input, shape index: {}]   ;;  %s513_s2 = inlined_call_operand.hbm [shape: f32[16,32], index: 2, kind: output, shape index: {}]  }
   0x1   :  { %9 = vsyncpa [#allocation3 + $0x1], 0  ;;  %s408_s9 = smov 0   ;;  %s410_s10 = smov 0  }
   0x2   :  { %s412_s11 = smov 0   ;;  %s414_s12 = smov 0  }
   0x3 LB: > { %s429_s13 = sadd.s32 4294967295, %s388_s12   ;;  %s269_s14 = sadd.s32 4294967294, %s388_s12   ;;  %s388_s12 = sphi %s414_s12, %s519_s12   ;;  %s384_s11 = sphi %s412_s11, %s518_s11   ;;  %s380_s10 = sphi %s410_s10, %s517_s10   ;;  %s376_s9 = sphi %s408_s9, %s516_s9  }
   0x4   : > { %s433_s15 = sadd.s32 1, %s388_s12   ;;  %s69_s16 = sadd.s32 1, %s384_s11 }
   0x5   : > { %s66_s17 = ssub.s32 %s388_s12, %s433_s15  ;;  %p79_p0 = scmp.ne.s32.totalorder %s384_s11, %s380_s10 }
   0x6   : > { %p67_p1 = scmp.eq.s32.totalorder %s66_s17, 0  ;;  %p80_p2 = scmp.eq.s32.totalorder %s429_s13, 1 }
   0x7   : > { %p85_p3 = scmp.ne.s32.totalorder %s380_s10, %s376_s9  ;;  %p86_p4 = scmp.eq.s32.totalorder %s269_s14, 1 }
   0x8   : > { %s444_s18 = scalar_select %p67_p1, %s384_s11, %s69_s16  }
   0x9   : > { %p446_p5 = por %p80_p2, %p79_p0  ;;  %p450_p6 = por %p86_p4, %p85_p3 }
   0xa   : > { %p272_p7 = scmp.ge.s32.totalorder %s388_s12, 1  ;;  %p114_p8 = scmp.lt.s32.totalorder %s388_s12, 3 }
   0xc   : > { %p115_p9 = pnand %p272_p7, %p114_p8 }
   0xd   : > { %p135_p10 = scmp.lt.s32.totalorder (!%p115_p9), %s429_s13, 1  ;;  %v390_v0 = vmov (!%p115_p9), 0   ;;  %v275_v2 = vld [vmem:[%s512_s1] ss:$0 sm:$0xff] (!%p115_p9)  ;;  %s391_s28 = smov (!%p115_p9), 16   ;;  %vm192_vm5 = vcmask (!%p115_p9), 130048  }
   0xe   : > { %118 = sbr.rel (%p115_p9) target bundleno = 318 (0x13e), region = 28  ;;  %325 = vset.pattern.permute.xlu0 (!%p115_p9), %v390_v0  ;;  %s132_s29 = sand.u32 (!%p115_p9), 1, %s380_s10   ;;  %vm194_vm6 = vcmask (!%p115_p9), 261120  }
   0xf   : > { %s273_s30 = sshll.u32 (!%p115_p9), %s132_s29, 3  ;;  %s277_s3 = sshll.u32 (!%p115_p9), %s429_s13, 7 }
  0x10   : > { %s134_s4 = scalar_lea.vmem (!%p115_p9), [#allocation2], %s273_s30  ;;  %s469_s8 = scalar_lea.hbm (!%p115_p9), %s513_s2, %s277_s3 }
  0x11   : > { %s210_s5 = sshll.u32 (!%p115_p9), %s134_s4, 4  ;;  %s197_s14 = scalar_lea.sflag (!%p115_p9), [#allocation3], %s132_s29  ;;  %s471_s5 = int_to_ptr.vmem [resolvable:$true] %s210_s5 }
  0x12   : > { %s326_s16 = scalar_lea.vmem (!%p115_p9), %s471_s5, 128 }
  0x13   : > { %p327_p11 = scmp.ne.s32.totalorder (!%p115_p9), %s471_s5, %s326_s16 }
  0x15   : > { %s136_s21 = scalar_select %p135_p10, %s429_s13, 1 }
  0x16   : > { %p328_p12 = pnand %p327_p11, %p446_p5  ;;  %s392_s13 = smov [#allocation2]  }
  0x17   : > { %s274_s22 = sshll.u32 %s136_s21, 3  ;;  %s330_s17 = sshll.u32 %s392_s13, 4  ;;  %s331_s17 = int_to_ptr.vmem [resolvable:$false] %s330_s17 }
  0x18   : > { %s138_s25 = scalar_lea.vmem %s511_s0, %s274_s22  ;;  %p329_p13 = pneg %p328_p12 }
  0x19   : > { %v139_v1 = vld [vmem:[%s138_s25] sm:$0xff]  ;;  %s332_s21 = scalar_lea.vmem %s331_s17, 256  ;;  %p333_p0 = scmp.lt.s32.totalorder %s471_s5, %s331_s17 }
  0x1a   : > { %143 = vperm.xlu0 %325, %v139_v1   ;;  %p334_p1 = scmp.lt.s32.totalorder %s332_s21, %s326_s16 }
  0x1c   : > { %p335_p2 = por %p334_p1, %p333_p0 }
  0x1e   : > { %p336_p3 = pnand %p335_p2, %p329_p13 }
  0x99   : > { %v144_v3 = vpop.permute.xlu0 %143 }
  0x9a   : > { %v152_v4 = vmul.f32 %v275_v2, %v144_v3 }
  0x9c   : > { %v153_v5 = vmul.f32 4.0, %v152_v4 }
  0x9e   : > { %v280_v6 = vround.rtne.f32 %v153_v5  ;;  %v283_v15 = vcvt.f32.s32 %v153_v5 }
  0xa0   : > { %v156_v7 = vmul.f32 0.25, %v280_v6  ;;  %v175_v20 = vand.u32 3, %v283_v15 }
  0xa2   : > { %v157_v8 = vsub.f32 %v152_v4, %v156_v7  ;;  %v176_v25 = vand.u32 1, %v175_v20  ;;  %vm183_vm1 = vcmp.eq.s32.totalorder %v175_v20, 1  ;;  %vm184_vm2 = vcmp.eq.s32.totalorder %v175_v20, 2 }
  0xa3   : > { %vm185_vm3 = vmor %vm183_vm1, %vm184_vm2  ;;  %vm180_vm4 = vcmp.ge.s32.totalorder %v175_v20, 2 }
  0xa4   : > { %v158_v9 = vmul.f32 6.2831855, %v157_v8  ;;  %vm177_vm0 = vcmp.eq.s32.totalorder %v176_v25, 1 }
  0xa6   : > { %v159_v10 = vmul.f32 %v158_v9, %v158_v9 }
  0xa8   : > { %v160_v11 = vmul.f32 -0.0001984127, %v159_v10  ;;  %v167_v12 = vmul.f32 2.4801588e-05, %v159_v10 }
  0xaa   : > { %v161_v13 = vadd.f32 0.008333334, %v160_v11  ;;  %v168_v14 = vadd.f32 -0.0013888889, %v167_v12 }
  0xac   : > { %v162_v16 = vmul.f32 %v161_v13, %v159_v10  ;;  %v169_v17 = vmul.f32 %v168_v14, %v159_v10 }
  0xae   : > { %v163_v18 = vadd.f32 -0.16666667, %v162_v16  ;;  %v170_v19 = vadd.f32 0.041666668, %v169_v17 }
  0xb0   : > { %v164_v21 = vmul.f32 %v163_v18, %v159_v10  ;;  %v171_v22 = vmul.f32 %v170_v19, %v159_v10 }
  0xb2   : > { %v165_v23 = vadd.f32 1.0, %v164_v21  ;;  %v172_v24 = vadd.f32 -0.5, %v171_v22 }
  0xb4   : > { %v173_v26 = vmul.f32 %v172_v24, %v159_v10  ;;  %v166_v27 = vmul.f32 %v165_v23, %v158_v9 }
  0xb6   : > { %v174_v28 = vadd.f32 1.0, %v173_v26 }
  0xb8   : > { %v179_v29 = vsel %vm177_vm0, %v166_v27, %v174_v28  ;;  %v178_v30 = vsel %vm177_vm0, %v174_v28, %v166_v27 }
  0xb9   : > { %v186_v31 = vsub.f32 0.0, %v179_v29  ;;  %v181_v32 = vsub.f32 0.0, %v178_v30 }
  0xbb   : > { %v187_v33 = vsel %vm185_vm3, %v186_v31, %v179_v29  ;;  %v182_v34 = vsel %vm180_vm4, %v181_v32, %v178_v30 }
  0xbc   : > { %189 = vrot.lane.b32.xlu0 %v187_v33, %s391_s28 }
 0x12e   : > { %v190_v35 = vpop.permute.xlu0 %189 }
 0x12f   : > { %v193_v36 = vsel %vm192_vm5, %v182_v34, %v190_v35 }
 0x130   : > { %195 = vst.msk [vmem:[%s134_s4] sm:$0xff] %vm194_vm6, %v193_v36 }
 0x131   : > { %339 = shalt.err (!%p336_p3)
}
 0x132   : > { %s340_s22 = scalar_lea.hbm %s469_s8, 128  ;;  %s344_s25 = scalar_lea.hbm %s513_s2, 256 }
 0x133   : > { %p341_p4 = scmp.ne.s32.totalorder %s469_s8, %s340_s22  ;;  %p345_p9 = scmp.lt.u32.totalorder %s469_s8, %s513_s2 }
 0x134   : > { %p346_p10 = scmp.lt.u32.totalorder %s344_s25, %s340_s22  ;;  %p348_p12 = scmp.lt.u32.totalorder %s340_s22, %s469_s8 }
 0x135   : > { %p342_p7 = pnand %p341_p4, %p446_p5 }
 0x136   : > { %p347_p11 = por %p346_p10, %p345_p9 }
 0x137   : > { %p343_p8 = pneg %p342_p7 }
 0x138   : > { %p349_p13 = por %p348_p12, %p347_p11 }
 0x13a   : > { %p350_p0 = pnand %p349_p13, %p343_p8 }
 0x13c   : > { %353 = shalt.err (!%p350_p0)
}
 0x13d   : > { %284 = dma.vmem_to_hbm [thread:$0]  (%p446_p5), %s471_s5, 128, %s469_s8, %s197_s14  }
 0x13e PF: > { %p290_p1 = scmp.ge.s32.totalorder %s388_s12, 2  ;;  %s222_s28 = sand.u32 1, %s376_s9  }
 0x13f   : > { %s223_s29 = scalar_lea.sflag [#allocation3], %s222_s28 }
 0x140   : > { %p287_p2 = pnand %p290_p1, %p450_p6 }
 0x142   : > { %371 = dma.done.wait (!%p287_p2), %s223_s29, 128  }
 0x143   : > { %373 = vsyncadd (!%p287_p2), %s223_s29, 4294967168  ;;  %p12_p3 = scmp.ge.s32.totalorder %s433_s15, 4   ;;  %s516_s9 = smov %s380_s10 }
 0x144   : > { %s517_s10 = smov %s384_s11  ;;  %s518_s11 = smov %s444_s18 }
 0x145   : > { %s519_s12 = smov %s433_s15  ;;  %14 = sbr.rel (!%p12_p3) target bundleno = 3 (0x3), region = 63 }
 0x14c   :  { %228 = vsyncpa [#allocation3], 1 }
 0x14d   :  { %230 = vsyncpa [#allocation3 + $0x1], 1 }

</bundles_post_ra>
